<compile_context>
chip_gen: v5e
topology: v5e:2x2
jax: 0.10.0
libtpu: 0.0.40
codegen_flags: <defaults>
</compile_context>

<pallas_src>
import functools

import jax
import jax.numpy as jnp
from jax.experimental import pallas as pl
from jax.experimental.pallas import tpu as pltpu

NEG_SLOPE = 0.1  # LeakyReLU(0.1)


def _leaky(v):
    return jnp.where(v > 0, v, NEG_SLOPE * v)


# --------------------------------------------------------------------------
# Fused kernel.  Per grid step (b, j):
#   xp_ref  : (H+2, W*Cin)   f32   zero-row-padded image (lane-dense, per-b)
#   w1d_ref : (W*Cin, Kp)    bf16  kron(I_W, w1) + zero pad columns (Kp=128)
#   s1/b1   : (1, Kp)        f32   folded BN1 (zero in all pad columns)
#   w2d_ref : (3*Kp, W*C1)   bf16  Toeplitz 3x3 weights, dy slabs stacked on K
#   s2/b2   : (1, W*C1)      f32   folded BN2
#   o_ref   : (Hb, W*C1)     f32   output row-band (lane-dense)
# --------------------------------------------------------------------------
def fused_basic_block_kernel(xp_ref, w1d_ref, s1_ref, b1_ref,
                             w2d_ref, s2_ref, b2_ref, o_ref, *, H, Hb, Kp):
    j = pl.program_id(1)
    r0 = pl.multiple_of(j * Hb, Hb)      # first padded-x row of this band's halo

    # ---- band + halo rows of the pre-padded input (padded rows r0..r0+Hb+1) ----
    xh = xp_ref[pl.ds(r0, Hb + 2), :]                                  # (Hb+2, W*Cin)

    # ---- conv1x1 + BN1 + LeakyReLU: one lane-dense matmul (bf16 -> f32) ----
    h1 = jnp.dot(xh.astype(jnp.bfloat16), w1d_ref[...],
                 preferred_element_type=jnp.float32)                   # (Hb+2, Kp)
    h1 = _leaky(h1 * s1_ref[...] + b1_ref[...])

    # Zero the out-of-image halo rows (padded rows 0 and H+1): the 3x3 conv's
    # spatial padding must be exact zero (BN bias + leaky would leak otherwise).
    prow = r0 + jax.lax.broadcasted_iota(jnp.int32, (Hb + 2, Kp), 0)
    h1 = jnp.where((prow >= 1) & (prow <= H), h1, 0.0)

    # ---- 3x3 conv: ONE K = 3*Kp matmul (dy taps lane-concatenated), f32 acc ----
    lhs = jnp.concatenate(
        [h1[dy:dy + Hb, :].astype(jnp.bfloat16) for dy in range(3)], axis=-1)
    acc = jnp.dot(lhs, w2d_ref[...], preferred_element_type=jnp.float32)  # (Hb, W*C1)

    # ---- BN2 + LeakyReLU + residual, full-lane (128) unmasked store ----
    y = _leaky(acc * s2_ref[...] + b2_ref[...])
    o_ref[...] = y + xp_ref[pl.ds(r0 + 1, Hb), :]        # f32 residual add


# --------------------------------------------------------------------------
# Wrapper: full BasicBlock forward (NCHW in / NCHW out)
# --------------------------------------------------------------------------
def basic_block_forward(x_nchw, params, *, band_rows=8):
    w1, scale1, bias1, w2, scale2, bias2 = params
    N, Cin, H, W = x_nchw.shape
    C0 = w1.shape[1]
    C1 = w2.shape[3]
    assert C1 == Cin, "residual add requires planes[1] == inplanes"

    Hb = band_rows if (H % band_rows == 0) else H
    NB = H // Hb

    K0 = (W + 2) * C0                     # logical folded width (72 at test shape)
    Kp = pl.cdiv(K0, 128) * 128           # padded to full 128-lane width

    # Lane-dense activations, pre-padded with one zero row top & bottom:
    # (N, H+2, W*Cin); padded row p corresponds to original row p-1.
    x_dense = (jnp.transpose(x_nchw, (0, 2, 3, 1))
               .astype(jnp.float32).reshape(N, H, W * Cin))
    x_pad = jnp.pad(x_dense, ((0, 0), (1, 1), (0, 0)))

    # conv1 (1x1) as one matmul: block-diagonal kron(I_W, w1), with zero columns
    # for the left/right 3x3 spatial pad AND for the 72->128 lane padding.
    w1d = jnp.kron(jnp.eye(W, dtype=jnp.float32), w1)                  # (W*Cin, W*C0)
    w1d = jnp.pad(w1d, ((0, 0), (C0, C0 + Kp - K0))).astype(jnp.bfloat16)
    s1d = jnp.pad(jnp.tile(scale1, (1, W)), ((0, 0), (C0, C0 + Kp - K0)))
    b1d = jnp.pad(jnp.tile(bias1, (1, W)), ((0, 0), (C0, C0 + Kp - K0)))

    # conv2 (3x3, pad=1): Toeplitz-style weights, one slab per dy, stacked on K:
    #   w2d[dy*Kp + (w+dx)*C0 + ci, w*C1 + co] = w2[dy, dx, ci, co]
    slabs = []
    for dy in range(3):
        slab = sum(jnp.kron(jnp.eye(W + 2, W, k=-dx, dtype=jnp.float32), w2[dy, dx])
                   for dx in range(3))                                 # (K0, W*C1)
        slabs.append(jnp.pad(slab, ((0, Kp - K0), (0, 0))))            # (Kp, W*C1)
    w2d = jnp.concatenate(slabs, axis=0).astype(jnp.bfloat16)          # (3*Kp, W*C1)
    s2d = jnp.tile(scale2, (1, W))                                     # (1, W*C1)
    b2d = jnp.tile(bias2, (1, W))

    kern = functools.partial(fused_basic_block_kernel, H=H, Hb=Hb, Kp=Kp)

    out_dense = pl.pallas_call(
        kern,
        out_shape=jax.ShapeDtypeStruct((N, H, W * C1), jnp.float32),
        grid=(N, NB),
        in_specs=[
            pl.BlockSpec((None, H + 2, W * Cin), lambda b, j: (b, 0, 0)),
            pl.BlockSpec((W * Cin, Kp), lambda b, j: (0, 0)),
            pl.BlockSpec((1, Kp), lambda b, j: (0, 0)),
            pl.BlockSpec((1, Kp), lambda b, j: (0, 0)),
            pl.BlockSpec((3 * Kp, W * C1), lambda b, j: (0, 0)),
            pl.BlockSpec((1, W * C1), lambda b, j: (0, 0)),
            pl.BlockSpec((1, W * C1), lambda b, j: (0, 0)),
        ],
        out_specs=pl.BlockSpec((None, Hb, W * C1), lambda b, j: (b, j, 0)),
        compiler_params=pltpu.CompilerParams(
            dimension_semantics=("parallel", "parallel"),
            vmem_limit_bytes=32 * 1024 * 1024),
    )(x_pad, w1d, s1d, b1d, w2d, s2d, b2d)

    out = out_dense.reshape(N, H, W, C1)
    return jnp.transpose(out, (0, 3, 1, 2))  # back to NCHW


# --------------------------------------------------------------------------
# Pure-JAX reference (for correctness check)
# --------------------------------------------------------------------------
def reference(x_nchw, params):
    w1, scale1, bias1, w2, scale2, bias2 = params
    x = jnp.transpose(x_nchw, (0, 2, 3, 1)).astype(jnp.float32)
    dn = ('NHWC', 'HWIO', 'NHWC')
    hp = jax.lax.Precision.HIGHEST
    h1 = jax.lax.conv_general_dilated(x, w1.reshape(1, 1, *w1.shape), (1, 1),
                                      'SAME', dimension_numbers=dn, precision=hp)
    h1 = _leaky(h1 * scale1 + bias1)
    h2 = jax.lax.conv_general_dilated(h1, w2, (1, 1), 'SAME',
                                      dimension_numbers=dn, precision=hp)
    h2 = _leaky(h2 * scale2 + bias2)
    return jnp.transpose(h2 + x, (0, 3, 1, 2))


# --------------------------------------------------------------------------
# Deterministic parameter construction (folded BatchNorm)
# --------------------------------------------------------------------------
def make_params(inplanes, planes, key):
    k1, k2 = jax.random.split(key)
    w1 = 0.1 * jax.random.normal(k1, (inplanes, planes[0]), jnp.float32)
    w2 = 0.1 * jax.random.normal(k2, (3, 3, planes[0], planes[1]), jnp.float32)

    def bn_fold(c):
        gamma = 1.0 + 0.05 * jnp.arange(c, dtype=jnp.float32)
        beta = 0.02 * jnp.arange(c, dtype=jnp.float32)
        mean = 0.01 * jnp.arange(c, dtype=jnp.float32)
        var = 1.0 + 0.1 * jnp.arange(c, dtype=jnp.float32)
        eps = 1e-5
        scale = gamma / jnp.sqrt(var + eps)
        bias = beta - mean * scale
        return scale.reshape(1, c), bias.reshape(1, c)

    scale1, bias1 = bn_fold(planes[0])
    scale2, bias2 = bn_fold(planes[1])
    return (w1, scale1, bias1, w2, scale2, bias2)


if __name__ == "__main__":
    key = jax.random.PRNGKey(0)
    kp, kx = jax.random.split(key)

    inplanes = 8
    planes = (4, 8)                       # darknet style: [inplanes//2, inplanes]
    N, H, W = 2, 16, 16

    params = make_params(inplanes, planes, kp)
    x = jax.random.normal(kx, (N, inplanes, H, W), jnp.float32)   # NCHW input

    out = jax.block_until_ready(basic_block_forward(x, params))
    ref = jax.block_until_ready(reference(x, params))

    assert out.shape == (N, planes[1], H, W)
    err = jnp.max(jnp.abs(out - ref))
    # bf16 MXU operands (f32 accumulate) vs f32-HIGHEST reference -> ~1e-2 tol.
    assert jnp.allclose(out, ref, rtol=2e-2, atol=2e-2), f"max abs diff = {err}"

    print("KERNEL_OK")
</pallas_src>

<mosaic_0001>
module attributes {stable_mosaic.version = 11 : i64} {
  func.func @fused_basic_block_kernel(%arg0: i32, %arg1: i32, %arg2: memref<1x18x128xf32, #tpu.memory_space<vmem>>, %arg3: memref<128x128xbf16, #tpu.memory_space<vmem>>, %arg4: memref<1x128xf32, #tpu.memory_space<vmem>>, %arg5: memref<1x128xf32, #tpu.memory_space<vmem>>, %arg6: memref<384x128xbf16, #tpu.memory_space<vmem>>, %arg7: memref<1x128xf32, #tpu.memory_space<vmem>>, %arg8: memref<1x128xf32, #tpu.memory_space<vmem>>, %arg9: memref<1x8x128xf32, #tpu.memory_space<vmem>>) attributes {dimension_semantics = [#tpu.dimension_semantics<parallel>, #tpu.dimension_semantics<parallel>], iteration_bounds = array<i64: 2, 2>, scalar_prefetch = 0 : i64, scratch_operands = 0 : i64, tpu.core_type = #tpu.core_type<tc>, window_params = [{transform_indices = @transform_0, window_bounds = array<i64: 1, 18, 128>}, {pipeline_mode = #tpu.pipeline_mode<synchronous>, transform_indices = @transform_1, window_bounds = array<i64: 128, 128>}, {pipeline_mode = #tpu.pipeline_mode<synchronous>, transform_indices = @transform_2, window_bounds = array<i64: 1, 128>}, {pipeline_mode = #tpu.pipeline_mode<synchronous>, transform_indices = @transform_3, window_bounds = array<i64: 1, 128>}, {pipeline_mode = #tpu.pipeline_mode<synchronous>, transform_indices = @transform_4, window_bounds = array<i64: 384, 128>}, {pipeline_mode = #tpu.pipeline_mode<synchronous>, transform_indices = @transform_5, window_bounds = array<i64: 1, 128>}, {pipeline_mode = #tpu.pipeline_mode<synchronous>, transform_indices = @transform_6, window_bounds = array<i64: 1, 128>}, {transform_indices = @transform_7, window_bounds = array<i64: 1, 8, 128>}]} {
    %c8_i32 = arith.constant 8 : i32
    %0 = arith.muli %arg1, %c8_i32 : i32
    %1 = tpu.assume_multiple %0, 8 : i32
    %c0 = arith.constant 0 : index
    %2 = arith.index_cast %1 : i32 to index
    %c0_0 = arith.constant 0 : index
    %3 = vector.load %arg2[%c0, %2, %c0_0] : memref<1x18x128xf32, #tpu.memory_space<vmem>>, vector<1x10x128xf32>
    %4 = vector.shape_cast %3 : vector<1x10x128xf32> to vector<10x128xf32>
    %5 = arith.truncf %4 : vector<10x128xf32> to vector<10x128xbf16>
    %c0_1 = arith.constant 0 : index
    %c0_2 = arith.constant 0 : index
    %6 = vector.load %arg3[%c0_1, %c0_2] : memref<128x128xbf16, #tpu.memory_space<vmem>>, vector<128x128xbf16>
    %cst = arith.constant dense<0.000000e+00> : vector<10x128xf32>
    %7 = tpu.matmul %5, %6, %cst {dimension_numbers = #tpu.dot_dimension_numbers<[1], [0], [0], [1], [0, 0, 1, 1], [], []>} : vector<10x128xbf16>, vector<128x128xbf16>, vector<10x128xf32> -> vector<10x128xf32>
    %c0_3 = arith.constant 0 : index
    %c0_4 = arith.constant 0 : index
    %8 = vector.load %arg4[%c0_3, %c0_4] : memref<1x128xf32, #tpu.memory_space<vmem>>, vector<1x128xf32>
    %9 = vector.broadcast %8 : vector<1x128xf32> to vector<10x128xf32>
    %10 = arith.mulf %7, %9 : vector<10x128xf32>
    %c0_5 = arith.constant 0 : index
    %c0_6 = arith.constant 0 : index
    %11 = vector.load %arg5[%c0_5, %c0_6] : memref<1x128xf32, #tpu.memory_space<vmem>>, vector<1x128xf32>
    %12 = vector.broadcast %11 : vector<1x128xf32> to vector<10x128xf32>
    %13 = arith.addf %10, %12 : vector<10x128xf32>
    %cst_7 = arith.constant 0.000000e+00 : f32
    %14 = vector.broadcast %cst_7 : f32 to vector<10x128xf32>
    %15 = arith.cmpf ogt, %13, %14 : vector<10x128xf32>
    %cst_8 = arith.constant 1.000000e-01 : f32
    %16 = vector.broadcast %cst_8 : f32 to vector<10x128xf32>
    %17 = arith.mulf %16, %13 : vector<10x128xf32>
    %18 = arith.select %15, %13, %17 : vector<10x128xi1>, vector<10x128xf32>
    %19 = tpu.iota {dimensions = array<i32: 0>} : vector<10x128xi32>
    %20 = vector.broadcast %1 : i32 to vector<10x128xi32>
    %21 = arith.addi %20, %19 : vector<10x128xi32>
    %c1_i32 = arith.constant 1 : i32
    %22 = vector.broadcast %c1_i32 : i32 to vector<10x128xi32>
    %23 = arith.cmpi sge, %21, %22 : vector<10x128xi32>
    %c16_i32 = arith.constant 16 : i32
    %24 = vector.broadcast %c16_i32 : i32 to vector<10x128xi32>
    %25 = arith.cmpi sle, %21, %24 : vector<10x128xi32>
    %26 = arith.andi %23, %25 : vector<10x128xi1>
    %cst_9 = arith.constant 0.000000e+00 : f32
    %27 = vector.broadcast %cst_9 : f32 to vector<10x128xf32>
    %28 = arith.select %26, %18, %27 : vector<10x128xi1>, vector<10x128xf32>
    %29 = vector.extract_strided_slice %28 {offsets = [0, 0], sizes = [8, 128], strides = [1, 1]} : vector<10x128xf32> to vector<8x128xf32>
    %30 = arith.truncf %29 : vector<8x128xf32> to vector<8x128xbf16>
    %31 = vector.extract_strided_slice %28 {offsets = [1, 0], sizes = [8, 128], strides = [1, 1]} : vector<10x128xf32> to vector<8x128xf32>
    %32 = arith.truncf %31 : vector<8x128xf32> to vector<8x128xbf16>
    %33 = vector.extract_strided_slice %28 {offsets = [2, 0], sizes = [8, 128], strides = [1, 1]} : vector<10x128xf32> to vector<8x128xf32>
    %34 = arith.truncf %33 : vector<8x128xf32> to vector<8x128xbf16>
    %35 = tpu.concatenate %30, %32, %34 in 1 : vector<8x128xbf16>, vector<8x128xbf16>, vector<8x128xbf16> -> vector<8x384xbf16>
    %c0_10 = arith.constant 0 : index
    %c0_11 = arith.constant 0 : index
    %36 = vector.load %arg6[%c0_10, %c0_11] : memref<384x128xbf16, #tpu.memory_space<vmem>>, vector<384x128xbf16>
    %cst_12 = arith.constant dense<0.000000e+00> : vector<8x128xf32>
    %37 = tpu.matmul %35, %36, %cst_12 {dimension_numbers = #tpu.dot_dimension_numbers<[1], [0], [0], [1], [0, 0, 1, 1], [], []>} : vector<8x384xbf16>, vector<384x128xbf16>, vector<8x128xf32> -> vector<8x128xf32>
    %c0_13 = arith.constant 0 : index
    %c0_14 = arith.constant 0 : index
    %38 = vector.load %arg7[%c0_13, %c0_14] : memref<1x128xf32, #tpu.memory_space<vmem>>, vector<1x128xf32>
    %39 = vector.broadcast %38 : vector<1x128xf32> to vector<8x128xf32>
    %40 = arith.mulf %37, %39 : vector<8x128xf32>
    %c0_15 = arith.constant 0 : index
    %c0_16 = arith.constant 0 : index
    %41 = vector.load %arg8[%c0_15, %c0_16] : memref<1x128xf32, #tpu.memory_space<vmem>>, vector<1x128xf32>
    %42 = vector.broadcast %41 : vector<1x128xf32> to vector<8x128xf32>
    %43 = arith.addf %40, %42 : vector<8x128xf32>
    %cst_17 = arith.constant 0.000000e+00 : f32
    %44 = vector.broadcast %cst_17 : f32 to vector<8x128xf32>
    %45 = arith.cmpf ogt, %43, %44 : vector<8x128xf32>
    %cst_18 = arith.constant 1.000000e-01 : f32
    %46 = vector.broadcast %cst_18 : f32 to vector<8x128xf32>
    %47 = arith.mulf %46, %43 : vector<8x128xf32>
    %48 = arith.select %45, %43, %47 : vector<8x128xi1>, vector<8x128xf32>
    %c1_i32_19 = arith.constant 1 : i32
    %49 = arith.addi %1, %c1_i32_19 : i32
    %c0_20 = arith.constant 0 : index
    %50 = arith.index_cast %49 : i32 to index
    %c0_21 = arith.constant 0 : index
    %51 = vector.load %arg2[%c0_20, %50, %c0_21] : memref<1x18x128xf32, #tpu.memory_space<vmem>>, vector<1x8x128xf32>
    %52 = vector.shape_cast %51 : vector<1x8x128xf32> to vector<8x128xf32>
    %53 = arith.addf %48, %52 : vector<8x128xf32>
    %c0_22 = arith.constant 0 : index
    %c0_23 = arith.constant 0 : index
    %c0_24 = arith.constant 0 : index
    %54 = vector.load %arg9[%c0_22, %c0_23, %c0_24] : memref<1x8x128xf32, #tpu.memory_space<vmem>>, vector<1x8x128xf32>
    %55 = vector.shape_cast %54 : vector<1x8x128xf32> to vector<8x128xf32>
    %56 = vector.shape_cast %53 : vector<8x128xf32> to vector<1x8x128xf32>
    tpu.vector_store %arg9[%c0_22, %c0_23, %c0_24], %56 {strides = array<i32>} : memref<1x8x128xf32, #tpu.memory_space<vmem>>, vector<1x8x128xf32>,
    return
  }
  func.func @transform_0(%arg0: i32, %arg1: i32) -> (i32, i32, i32) {
    %c0_i32 = arith.constant 0 : i32
    %c0_i32_0 = arith.constant 0 : i32
    %c0_i32_1 = arith.constant 0 : i32
    return %arg0, %c0_i32, %c0_i32_0 : i32, i32, i32
  }
  func.func @transform_1(%arg0: i32, %arg1: i32) -> (i32, i32) {
    %c0_i32 = arith.constant 0 : i32
    %c0_i32_0 = arith.constant 0 : i32
    %c0_i32_1 = arith.constant 0 : i32
    return %c0_i32, %c0_i32_0 : i32, i32
  }
  func.func @transform_2(%arg0: i32, %arg1: i32) -> (i32, i32) {
    %c0_i32 = arith.constant 0 : i32
    %c0_i32_0 = arith.constant 0 : i32
    %c0_i32_1 = arith.constant 0 : i32
    return %c0_i32, %c0_i32_0 : i32, i32
  }
  func.func @transform_3(%arg0: i32, %arg1: i32) -> (i32, i32) {
    %c0_i32 = arith.constant 0 : i32
    %c0_i32_0 = arith.constant 0 : i32
    %c0_i32_1 = arith.constant 0 : i32
    return %c0_i32, %c0_i32_0 : i32, i32
  }
  func.func @transform_4(%arg0: i32, %arg1: i32) -> (i32, i32) {
    %c0_i32 = arith.constant 0 : i32
    %c0_i32_0 = arith.constant 0 : i32
    %c0_i32_1 = arith.constant 0 : i32
    return %c0_i32, %c0_i32_0 : i32, i32
  }
  func.func @transform_5(%arg0: i32, %arg1: i32) -> (i32, i32) {
    %c0_i32 = arith.constant 0 : i32
    %c0_i32_0 = arith.constant 0 : i32
    %c0_i32_1 = arith.constant 0 : i32
    return %c0_i32, %c0_i32_0 : i32, i32
  }
  func.func @transform_6(%arg0: i32, %arg1: i32) -> (i32, i32) {
    %c0_i32 = arith.constant 0 : i32
    %c0_i32_0 = arith.constant 0 : i32
    %c0_i32_1 = arith.constant 0 : i32
    return %c0_i32, %c0_i32_0 : i32, i32
  }
  func.func @transform_7(%arg0: i32, %arg1: i32) -> (i32, i32, i32) {
    %c0_i32 = arith.constant 0 : i32
    %c0_i32_0 = arith.constant 0 : i32
    return %arg0, %arg1, %c0_i32 : i32, i32, i32
  }
}

</mosaic_0001>

<bundles_post_ra>
// kernel: tpu_custom_call.1
= control target key start
LH: loop header
LB: loop body
LE: loop exit
PB: predicated region body
PF: predicated region fallthrough
CT: control target
= control target key end

     0   :  { %s1425_s0 = inlined_call_operand.vmem [shape: f32[2,18,128], index: 0, kind: input, shape index: {}]   ;;  %s1426_s1 = inlined_call_operand.vmem [shape: bf16[128,128], index: 1, kind: input, shape index: {}]   ;;  %s1427_s2 = inlined_call_operand.vmem [shape: f32[1,128], index: 2, kind: input, shape index: {}]   ;;  %s1428_s3 = inlined_call_operand.vmem [shape: f32[1,128], index: 3, kind: input, shape index: {}]   ;;  %s1429_s4 = inlined_call_operand.hbm [shape: bf16[384,128], index: 4, kind: input, shape index: {}]   ;;  %s1430_s5 = inlined_call_operand.vmem [shape: f32[1,128], index: 5, kind: input, shape index: {}]   ;;  %s1431_s6 = inlined_call_operand.vmem [shape: f32[1,128], index: 6, kind: input, shape index: {}]   ;;  %s1432_s7 = inlined_call_operand.hbm [shape: f32[2,16,128], index: 7, kind: output, shape index: {}]  }
   0x1   :  { %1434 = sst [smem:[#allocation9_spill]] %s1429_s4 }
   0x2   :  { %12 = vsyncpa [#allocation3], 0 }
   0x3   :  { %13 = vsyncpa [#allocation4], 0 }
   0x4   :  { %15 = vsyncpa [#allocation4 + $0x1], 0  ;;  %s1238_s24 = smov 0   ;;  %s1240_s25 = smov 0  }
   0x5   :  { %s1242_s26 = smov 0   ;;  %s1244_s27 = smov 0  }
   0x6   :  { %s1246_s28 = smov 0   ;;  %s1248_s29 = smov 0  }
   0x7   :  { %s1250_s30 = smov 0   ;;  %s1252_s8 = smov 0  }
   0x8 LB: > { %s796_s9 = sadd.s32 4294967295, %s1193_s8   ;;  %s797_s10 = sadd.s32 4294967294, %s1193_s8   ;;  %s1193_s8 = sphi %s1252_s8, %s21_s8   ;;  %s1189_s30 = sphi %s1250_s30, %s1448_s30   ;;  %s1185_s29 = sphi %s1248_s29, %s1447_s29   ;;  %s1181_s28 = sphi %s1246_s28, %s1446_s28   ;;  %s1177_s27 = sphi %s1244_s27, %s1445_s27   ;;  %s1173_s26 = sphi %s1242_s26, %s1444_s26   ;;  %s1169_s25 = sphi %s1240_s25, %s1443_s25   ;;  %s1165_s24 = sphi %s1238_s24, %s1442_s24  }
   0x9   : > { %s30_s11 = sadd.s32 1, %s1185_s29  ;;  %s33_s12 = sadd.s32 1, %s1189_s30 }
   0xa   : > { %p31_p0 = scmp.ge.s32.totalorder %s30_s11, 2  ;;  %s194_s13 = sadd.s32 1, %s1173_s26 }
   0xb   : > { %p204_p1 = scmp.ne.s32.totalorder %s1173_s26, %s1169_s25  ;;  %p205_p2 = scmp.eq.s32.totalorder %s796_s9, 3 }
   0xc   : > { %s1450_s11 = smov (%p31_p0, %s30_s11), 0  ;;  %s1452_s12 = smov (!%p31_p0, %s33_s12), %s1189_s30 }
   0xd   : > { %s190_s14 = ssub.s32 %s1185_s29, %s1450_s11  ;;  %p1290_p3 = por %p205_p2, %p204_p1 }
   0xe   : > { %p35_p4 = scmp.ge.s32.totalorder %s1452_s12, 2  ;;  %p210_p5 = scmp.ne.s32.totalorder %s1169_s25, %s1165_s24 }
   0xf   : > { %p211_p6 = scmp.eq.s32.totalorder %s797_s10, 3  ;;  %p798_p7 = scmp.ge.s32.totalorder %s1193_s8, 1 }
  0x10   : > { %s1454_s12 = smov (%p35_p4, %s1452_s12), 0  ;;  %p218_p9 = scmp.lt.s32.totalorder %s1193_s8, 5 }
  0x11   : > { %1436 = sst [smem:[#allocation8_spill]] %s1454_s12  ;;  %p1299_p8 = por %p211_p6, %p210_p5 }
  0x12   : > { %s189_s17 = ssub.s32 %s1189_s30, %s1454_s12  ;;  %p1306_p10 = pnand %p798_p7, %p218_p9 }
  0x13   : > { %s191_s18 = sor.u32 %s190_s14, %s189_s17  ;;  %p1310_p12 = scmp.eq.s32.totalorder %s796_s9, 0 }
  0x14   : > { %p192_p11 = scmp.eq.s32.totalorder %s191_s18, 0  ;;  %p983_p13 = pneg %p1306_p10 }
  0x15   : > { %s1440_s4 = sld [smem:[#allocation9_spill]]  ;;  %s1195_s14 = smov [#allocation2]  }
  0x16   : > { %s1320_s10 = scalar_select %p192_p11, %s1173_s26, %s194_s13  }
  0x17   : > { %s240_s17 = sshll.u32 %s1195_s14, 4  ;;  %p984_p0 = pnand %p1310_p12, %p983_p13  ;;  %s241_s17 = int_to_ptr.vmem [resolvable:$true] %s240_s17 }
  0x18   : > { %s1196_s18 = smov 64   ;;  %s1197_s9 = smov 4  }
  0x19   : > { %270 = sbr.rel (%p1306_p10) target bundleno = 365 (0x16d), region = 48 }
  0x1b   : > { %s238_s23 = sshll.u32 %s1440_s4, 4  ;;  %s239_s23 = int_to_ptr.hbm [resolvable:$true] %s238_s23 }
  0x1c   : > { %986 = dma.hbm_to_vmem [thread:$0]  (!%p984_p0), %s239_s23, 3072, %s241_s17, [#allocation3], %s1196_s18, %s1196_s18, %s1197_s9  }
  0x1e   : > { %1156 = dma.done.wait (%p1310_p12), [#allocation3], 3072  }
  0x1f   : > { %1158 = vsyncadd (%p1310_p12), [#allocation3], 4294964224  ;;  %v951_v0 = vld [vmem:[%s1426_s1 + $0x38] sm:$0xff]  ;;  %v950_v1 = vld [vmem:[%s1426_s1 + $0x30] sm:$0xff]  ;;  %p303_p1 = scmp.lt.s32.totalorder %s1181_s28, 1  ;;  %s805_s17 = sshll.u32 %s1177_s27, 3  ;;  %v409_v34 = vlaneseq }
  0x20   : > { %377 = vmatpush.bf16.msra.mxu0 %v951_v0  ;;  %v959_v2 = vld [vmem:[#allocation2 + $0x38] sm:$0xff]  ;;  %v958_v3 = vld [vmem:[#allocation2 + $0x30] sm:$0xff]  ;;  %v949_v6 = vld [vmem:[%s1426_s1 + $0x28] sm:$0xff]  ;;  %v412_v37 = vstv %s805_s17  ;;  %s940_s14 = sshll.u32 %s1181_s28, 1  ;;  %s300_s19 = sand.u32 1, %s1169_s25  }
  0x21   : > { %632 = vmatpush.bf16.msra.mxu1 %v959_v2  ;;  %v975_v4 = vld [vmem:[#allocation2 + $0xb8] sm:$0xff]  ;;  %v974_v7 = vld [vmem:[#allocation2 + $0xb0] sm:$0xff]  ;;  %v957_v8 = vld [vmem:[#allocation2 + $0x28] sm:$0xff]  ;;  %s304_s18 = scalar_select %p303_p1, %s1181_s28, 1  ;;  %v410_v36 = vshrl.u32 %v409_v34, 7 }
  0x22   : > { %v967_v5 = vld [vmem:[#allocation2 + $0x78] sm:$0xff]  ;;  %658 = vmatpush.bf16.msra.mxu3 %v975_v4  ;;  %v948_v9 = vld [vmem:[%s1426_s1 + $0x20] sm:$0xff]  ;;  %v946_v13 = vld [vmem:[%s1426_s1 + $0x10] sm:$0xff]  ;;  %s700_s20 = sadd.s32 %s1177_s27, %s940_s14  ;;  %s803_s4 = sshll.u32 %s300_s19, 3 }
  0x23   : > { %645 = vmatpush.bf16.msra.mxu2 %v967_v5  ;;  %v956_v10 = vld [vmem:[#allocation2 + $0x20] sm:$0xff]  ;;  %v947_v11 = vld [vmem:[%s1426_s1 + $0x18] sm:$0xff]  ;;  %s976_s21 = smul.u32 24, %s304_s18  ;;  %v954_v14 = vld [vmem:[#allocation2 + $0x10] sm:$0xff]  ;;  %v413_v39 = vadd.s32 %v412_v37, %v410_v36  ;;  %v411_v43 = vadd.s32 8, %v410_v36  ;;  %s941_s12 = sshll.u32 %s700_s20, 3 }
  0x24   : > { %378 = vmatpush.bf16.msra.mxu0 %v950_v1  ;;  %v955_v12 = vld [vmem:[#allocation2 + $0x18] sm:$0xff]  ;;  %v945_v15 = vld [vmem:[%s1426_s1 + $0x8] sm:$0xff]  ;;  %v944_v16 = vld [vmem:[%s1426_s1] sm:$0xff]  ;;  %s702_s28 = scalar_lea.hbm %s1432_s7, %s941_s12  ;;  %s302_s27 = scalar_lea.vmem [#allocation5], %s803_s4 }
  0x25   : > { %633 = vmatpush.bf16.msra.mxu1 %v958_v3  ;;  %s307_s23 = scalar_lea.vmem %s1425_s0, %s976_s21  ;;  %v966_v20 = vld [vmem:[#allocation2 + $0x70] sm:$0xff]  ;;  %v973_v21 = vld [vmem:[#allocation2 + $0xa8] sm:$0xff]  ;;  %v972_v24 = vld [vmem:[#allocation2 + $0xa0] sm:$0xff]  ;;  %vm415_vm0 = vcmp.ge.s32.totalorder %v413_v39, 1  ;;  %vm417_vm1 = vcmp.le.s32.totalorder %v413_v39, 16  ;;  %v414_v46 = vadd.s32 %v412_v37, %v411_v43  ;;  %s704_s14 = sshll.u32 %s302_s27, 4  ;;  %s705_s14 = int_to_ptr.vmem [resolvable:$true] %s704_s14 }
  0x26   : > { %659 = vmatpush.bf16.msra.mxu3 %v974_v7  ;;  %s1359_s18 = scalar_lea.vmem %s307_s23, %s805_s17  ;;  %v953_v22 = vld [vmem:[#allocation2 + $0x8] sm:$0xff]  ;;  %v952_v25 = vld [vmem:[#allocation2] sm:$0xff]  ;;  %v971_v27 = vld [vmem:[#allocation2 + $0x98] sm:$0xff]  ;;  %s706_s23 = sshll.u32 %s702_s28, 4  ;;  %s707_s23 = int_to_ptr.hbm [resolvable:$true] %s706_s23 }
  0x27   : > { %v310_v17 = vld [vmem:[%s1359_s18] sm:$0xff]  ;;  %v311_v18 = vld [vmem:[%s1359_s18 + $0x8] sm:$0x3]  ;;  %646 = vmatpush.bf16.msra.mxu2 %v966_v20  ;;  %v963_v28 = vld [vmem:[#allocation2 + $0x58] sm:$0xff]  ;;  %vm416_vm5 = vcmp.ge.s32.totalorder %v414_v46, 1  ;;  %vm418_vm6 = vcmp.le.s32.totalorder %v414_v46, 16 }
  0x28   : > { %379 = vmatpush.bf16.msra.mxu0 %v949_v6  ;;  %v312_v19 = vpack.c.bf16 %v311_v18, %v310_v17  ;;  %v965_v23 = vld [vmem:[#allocation2 + $0x68] sm:$0xff]  ;;  %v964_v26 = vld [vmem:[#allocation2 + $0x60] sm:$0xff]  ;;  %v970_v29 = vld [vmem:[#allocation2 + $0x90] sm:$0xff]  ;;  %s690_s20 = scalar_lea.sflag [#allocation4], %s300_s19  ;;  %s1109_s17 = sshra.s32 %s707_s23, 4  ;;  %s1110_s17 = int_to_ptr.hbm [resolvable:$true] %s1109_s17 }
  0x29   : > { %634 = vmatpush.bf16.msra.mxu1 %v957_v8  ;;  %v962_v30 = vld [vmem:[#allocation2 + $0x50] sm:$0xff]  ;;  %v969_v31 = vld [vmem:[#allocation2 + $0x88] sm:$0xff]  ;;  %v968_v33 = vld [vmem:[#allocation2 + $0x80] sm:$0xff]  ;;  %s1111_s9 = scalar_lea.hbm %s1110_s17, 8  ;;  %s1115_s12 = scalar_lea.hbm %s1432_s7, 32 }
  0x2a   : > { %660 = vmatpush.bf16.msra.mxu3 %v973_v21  ;;  %v961_v32 = vld [vmem:[#allocation2 + $0x48] sm:$0xff]  ;;  %v960_v35 = vld [vmem:[#allocation2 + $0x40] sm:$0xff]  ;;  %vm419_vm2 = vmand %vm415_vm0, %vm417_vm1  ;;  %p1112_p2 = scmp.ne.s32.totalorder %s1110_s17, %s1111_s9  ;;  %p1116_p6 = scmp.lt.s32.totalorder %s1110_s17, %s1432_s7 }
  0x2b   : > { %647 = vmatpush.bf16.msra.mxu2 %v965_v23  ;;  %v1061_v38 = vld [vmem:[%s1427_s2] ss:$0 sm:$0xff]  ;;  %vm934_vm4 = vmpackc.low %vm419_vm2, %vm419_vm2  ;;  %p1117_p7 = scmp.lt.s32.totalorder %s1115_s12, %s1111_s9 }
  0x2c   : > { %380 = vmatpush.bf16.msra.mxu0 %v948_v9  ;;  %v1062_v40 = vld [vmem:[%s1428_s3] ss:$0 sm:$0xff]  ;;  %vm420_vm8 = vmand %vm416_vm5, %vm418_vm6  ;;  %p1113_p4 = pnand %p1112_p2, %p1290_p3 }
  0x2d   : > { %635 = vmatpush.bf16.msra.mxu1 %v956_v10  ;;  %v1063_v7 = vld [vmem:[%s1430_s5] ss:$0 sm:$0xff]  ;;  %p1118_p9 = por %p1117_p7, %p1116_p6 }
  0x2e   : > { %661 = vmatpush.bf16.msra.mxu3 %v972_v24  ;;  %v1064_v9 = vld [vmem:[%s1431_s6] ss:$0 sm:$0xff]  ;;  %p1114_p5 = pneg %p1113_p4 }
  0x2f   : > { %648 = vmatpush.bf16.msra.mxu2 %v964_v26 }
  0x30   : > { %381 = vmatpush.bf16.msra.mxu0 %v947_v11  ;;  %p1119_p10 = pnand %p1118_p9, %p1114_p5 }
  0x31   : > { %636 = vmatpush.bf16.msra.mxu1 %v955_v12 }
  0x32   : > { %662 = vmatpush.bf16.msra.mxu3 %v971_v27 }
  0x33   : > { %649 = vmatpush.bf16.msra.mxu2 %v963_v28 }
  0x34   : > { %382 = vmatpush.bf16.msra.mxu0 %v946_v13 }
  0x35   : > { %637 = vmatpush.bf16.msra.mxu1 %v954_v14  ;;  %v938_v14 = vld [vmem:[%s1359_s18 + $0x1] sm:$0xff] }
  0x36   : > { %663 = vmatpush.bf16.msra.mxu3 %v970_v29 }
  0x37   : > { %650 = vmatpush.bf16.msra.mxu2 %v962_v30 }
  0x38   : > { %383 = vmatpush.bf16.msra.mxu0 %v945_v15 }
  0x39   : > { %638 = vmatpush.bf16.msra.mxu1 %v953_v22 }
  0x3a   : > { %664 = vmatpush.bf16.msra.mxu3 %v969_v31 }
  0x3b   : > { %651 = vmatpush.bf16.msra.mxu2 %v961_v32 }
  0x3c   : > { %384 = vmatpush.bf16.msra.mxu0 %v944_v16 }
  0x3d   : > { %639 = vmatpush.bf16.msra.mxu1 %v952_v25 }
  0x3e   : > { %665 = vmatpush.bf16.msra.mxu3 %v968_v33 }
  0x3f   : > { %385 = vmatmul.bf16.vlgmr.msra.gmra.mxu0 %v312_v19  ;;  %652 = vmatpush.bf16.msra.mxu2 %v960_v35 }
  0xbc   : > { %v386_v41 = vpop.f32.mrf.mxu0 }
  0xbd   : > { %v395_v42 = vmul.f32 %v1061_v38, %v386_v41 }
  0xbf   : > { %v401_v44 = vadd.f32 %v1062_v40, %v395_v42 }
  0xc1   : > { %v405_v45 = vmul.f32 0.1, %v401_v44  ;;  %vm403_vm3 = vcmp.gt.f32.partialorder %v401_v44, 0.0 }
  0xc3   : > { %v407_v47 = vsel %vm403_vm3, %v401_v44, %v405_v45 }
  0xc4   : > { %v388_v48 = vpop.f32.mrf.mxu0  ;;  %v935_v49 = vpack.c.bf16 %v407_v47, %v407_v47  ;;  %v421_v52 = vsel %vm419_vm2, %v407_v47, 0.0 }
  0xc5   : > { %v396_v50 = vmul.f32 %v1061_v38, %v388_v48  ;;  %v423_v55 = vpack.c.bf16 %v421_v52, %v421_v52 }
  0xc6   : > { %936 = vmatmul.msk.bf16.vlgmr.msra.gmra.mxu1 %vm934_vm4, %v935_v49 }
  0xc7   : > { %v402_v51 = vadd.f32 %v1062_v40, %v396_v50  ;;  %v427_v58 = vunpack.c.l.b16 %v423_v55 }
  0xc9   : > { %vm404_vm7 = vcmp.gt.f32.partialorder %v402_v51, 0.0  ;;  %v406_v53 = vmul.f32 0.1, %v402_v51 }
  0xcb   : > { %v408_v54 = vsel %vm404_vm7, %v402_v51, %v406_v53 }
  0xcc   : > { %v422_v56 = vsel %vm420_vm8, %v408_v54, 0.0 }
  0xcd   : > { %v424_v57 = vpack.c.bf16 %v422_v56, %v422_v56 }
  0xcf   : > { %v428_v59 = vunpack.c.l.b16 %v424_v57 }
  0xd1   : > { %v429_v60 = vpack.c.b16 %v428_v59, %v427_v58 }
  0xd3   : > { %v438_v61 = vrot.slane %v429_v60, 1  ;;  %v433_v62 = vshll.u32 %v429_v60, 16  ;;  %v431_v63 = vshrl.u32 %v429_v60, 16 }
  0xd5   : > { %666 = vmatmul.bf16.vlgmr.msra.gmra.mxu3 %v438_v61  ;;  %v435_v0 = vrot.slane %v433_v62, 1 }
  0xd7   : > { %v436_v1 = vor.u32 %v435_v0, %v431_v63 }
  0xd9   : > { %653 = vmatmul.bf16.vlgmr.msra.gmra.mxu2 %v436_v1 }
 0x143   : > { %v641_v2 = vpop.f32.mrf.mxu1 }
 0x14b   : > { %v643_v3 = vpop.f32.mrf.mxu1 }
 0x158   : > { %v667_v4 = vpop.f32.mrf.mxu3 }
 0x15c   : > { %v654_v5 = vpop.f32.mrf.mxu2 }
 0x15d   : > { %v655_v6 = vadd.f32 %v654_v5, %v641_v2 }
 0x15f   : > { %v668_v8 = vadd.f32 %v667_v4, %v655_v6 }
 0x160   : > { %v669_v10 = vpop.f32.mrf.mxu3 }
 0x161   : > { %v675_v11 = vmul.f32 %v1063_v7, %v668_v8 }
 0x163   : > { %v680_v12 = vadd.f32 %v1064_v9, %v675_v11 }
 0x164   : > { %v656_v13 = vpop.f32.mrf.mxu2 }
 0x165   : > { %vm681_vm9 = vcmp.gt.f32.partialorder %v680_v12, 0.0  ;;  %v682_v15 = vmul.f32 0.1, %v680_v12 }
 0x167   : > { %v683_v16 = vsel %vm681_vm9, %v680_v12, %v682_v15 }
 0x168   : > { %v687_v17 = vadd.f32 %v938_v14, %v683_v16 }
 0x16a   : > { %688 = vst [vmem:[%s302_s27] sm:$0xff] %v687_v17 }
 0x16b   : > { %1122 = shalt.err (!%p1119_p10)
}
 0x16c   : > { %981 = dma.vmem_to_hbm [thread:$0]  (%p1290_p3), %s705_s14, 128, %s707_s23, %s690_s20  }
 0x16d PF: > { %p993_p11 = scmp.ge.s32.totalorder %s1193_s8, 2  ;;  %s718_s19 = sand.u32 1, %s1165_s24  }
 0x16e   : > { %s719_s22 = scalar_lea.sflag [#allocation4], %s718_s19 }
 0x16f   : > { %p988_p12 = pnand %p993_p11, %p1299_p8 }
 0x171   : > { %p989_p13 = pneg %p988_p12 }
 0x173   : > { %1160 = dma.done.wait (%p989_p13), %s719_s22, 128  }
 0x174   : > { %1162 = vsyncadd (%p989_p13), %s719_s22, 4294967168  ;;  %s21_s8 = sadd.s32 1, %s1193_s8   ;;  %s1441_s15 = sld [smem:[#allocation8_spill]] }
 0x175   : > { %p18_p0 = scmp.ge.s32.totalorder %s21_s8, 6   ;;  %s1442_s24 = smov %s1169_s25 }
 0x176   : > { %s1443_s25 = smov %s1173_s26  ;;  %s1444_s26 = smov %s1320_s10 }
 0x177   : > { %s1445_s27 = smov %s1185_s29  ;;  %s1446_s28 = smov %s1189_s30 }
 0x178   : > { %s1447_s29 = smov %s1450_s11  ;;  %20 = sbr.rel (!%p18_p0) target bundleno = 8 (0x8), region = 90 }
 0x17a   : > { %s1448_s30 = smov %s1441_s15 }
 0x17d   :  { %725 = vsyncpa [#allocation3], 1 }
 0x17e   :  { %727 = vsyncpa [#allocation3 + $0x1], 1 }
 0x17f   :  { %728 = vsyncpa [#allocation4], 1 }
 0x180   :  { %730 = vsyncpa [#allocation4 + $0x1], 1 }

</bundles_post_ra>
